<compile_context>
chip_gen: v7x
topology: tpu7x:2x2x1
jax: 0.10.0
libtpu: 0.0.40
codegen_flags: <defaults>
</compile_context>

<pallas_src>
import jax
import jax.numpy as jnp
from jax.experimental import pallas as pl
from jax.experimental.pallas import tpu as pltpu

_LANE = 128


def _add_kernel(x1_ref, x2_ref, o_ref):
    o_ref[...] = x1_ref[...] + x2_ref[...]


def _min_sublane(dtype) -> int:
    # Minimum second-minor tile multiple for the dtype (f32: 8, bf16: 16, int8: 32).
    itemsize = jnp.dtype(dtype).itemsize
    return 8 * max(1, 4 // max(1, itemsize))


def _pick_lane_width(n: int, max_c: int = 2048) -> int:
    # Largest power-of-two multiple of 128 that divides n (capped at max_c).
    c = _LANE
    while c * 2 <= max_c and n % (c * 2) == 0:
        c *= 2
    return c


def _pick_tile_rows(r: int, c: int, itemsize: int, sub: int,
                    target_block_bytes: int) -> int:
    """Biggest row-tile (multiple of `sub`) within the per-tile VMEM budget.

    Only accept an evenly-dividing tile if it is >= ~target/2; otherwise keep
    the target and eat one masked ragged last block (far cheaper than dropping
    into the small-tile regime on awkward row counts, e.g. r = 8 * large_prime).
    """
    target = max(sub, (target_block_bytes // (c * itemsize)) // sub * sub)
    if r <= target:
        return r                      # single block along rows (equals full dim)
    lo = max(sub, (target // 2) // sub * sub)
    for t in range(target, lo - 1, -sub):
        if r % t == 0:
            return t                  # even divisor, still a large tile
    return target                     # ragged (masked) last block


def _chip_tuning():
    """Returns (target_block_bytes per input tile, vmem_limit_bytes or None)."""
    try:
        kind = jax.devices()[0].device_kind.lower()
    except Exception:
        kind = ""
    if "v7" in kind:
        # ~3.2 TB/s HBM but only 64 MiB VMEM: 6 MiB tiles -> 36 MiB scoped.
        return 6 << 20, 40 << 20
    if "v6" in kind:
        # ~1.4 TB/s HBM, 128 MiB VMEM: 8 MiB tiles -> 48 MiB scoped.
        return 8 << 20, 64 << 20
    # v5e (16 MiB default scoped VMEM) and unknown chips: 2 MiB tiles -> 12 MiB.
    return 2 << 20, None


def vector_add(x1, x2, *, target_block_bytes=None, vmem_limit_bytes=None,
               small_threshold_bytes: int = 256 * 1024, donate_x1: bool = False):
    assert x1.shape == x2.shape and x1.dtype == x2.dtype
    orig_shape = x1.shape
    n = x1.size
    itemsize = jnp.dtype(x1.dtype).itemsize

    # Tiny tensors: kernel-launch + per-step overhead dominates; XLA's fused
    # add is strictly faster.
    if n == 0 or n * itemsize < small_threshold_bytes:
        return x1 + x2

    # Flat size not a multiple of 128 lanes: XLA's fused add already streams
    # exactly 3n bytes; any pad+slice / prefix+concat Pallas variant adds
    # whole-array copies for a memory-bound op, so fall back instead.
    if n % _LANE != 0:
        return x1 + x2

    if target_block_bytes is None or vmem_limit_bytes is None:
        auto_tb, auto_vl = _chip_tuning()
        if target_block_bytes is None:
            target_block_bytes = auto_tb
        if vmem_limit_bytes is None:
            vmem_limit_bytes = auto_vl

    sub = _min_sublane(x1.dtype)
    c = _pick_lane_width(n)
    r = n // c
    tile_rows = _pick_tile_rows(r, c, itemsize, sub, target_block_bytes)
    grid = (pl.cdiv(r, tile_rows),)

    a2 = x1.reshape(r, c)
    b2 = x2.reshape(r, c)

    spec = pl.BlockSpec((tile_rows, c), lambda i: (i, 0))
    out2 = pl.pallas_call(
        _add_kernel,
        out_shape=jax.ShapeDtypeStruct((r, c), x1.dtype),
        grid=grid,
        in_specs=[spec, spec],
        out_specs=spec,
        input_output_aliases={0: 0} if donate_x1 else {},
        compiler_params=pltpu.CompilerParams(
            dimension_semantics=("parallel",),
            vmem_limit_bytes=vmem_limit_bytes),
        cost_estimate=pl.CostEstimate(
            flops=n, transcendentals=0, bytes_accessed=3 * n * itemsize),
    )(a2, b2)

    return out2.reshape(orig_shape)


if __name__ == "__main__":
    key = jax.random.PRNGKey(0)

    # 1) Main demo shape (lane-aligned): forced through the Pallas path
    #    (small_threshold_bytes=0 disables the tiny-input XLA shortcut).
    k1, k2 = jax.random.split(key)
    shape = (2, 4, 16, 16)
    x1 = jax.random.normal(k1, shape, dtype=jnp.float32)
    x2 = jax.random.normal(k2, shape, dtype=jnp.float32)
    y = vector_add(x1, x2, small_threshold_bytes=0)
    jax.block_until_ready(y)
    ref = x1 + x2
    assert y.shape == ref.shape and y.dtype == ref.dtype
    assert jnp.allclose(y, ref), "mismatch vs reference add (aligned path)"

    # 2) Multi-step grid with a masked ragged last block: 20 rows x 2048 lanes
    #    with an 8-row tile budget -> grid of 3 steps, final block = 4 rows.
    k3, k4 = jax.random.split(k1)
    a = jax.random.normal(k3, (40, 32, 32), dtype=jnp.float32)
    b = jax.random.normal(k4, (40, 32, 32), dtype=jnp.float32)
    yb = vector_add(a, b, small_threshold_bytes=0,
                    target_block_bytes=8 * 2048 * 4)
    jax.block_until_ready(yb)
    assert jnp.allclose(yb, a + b), "mismatch vs reference (ragged last block)"

    # 3) Flat size not divisible by 128: bandwidth-optimal XLA fallback.
    k5, k6 = jax.random.split(k2)
    c1 = jax.random.normal(k5, (5, 7, 11), dtype=jnp.float32)
    c2 = jax.random.normal(k6, (5, 7, 11), dtype=jnp.float32)
    yc = vector_add(c1, c2, small_threshold_bytes=0)
    jax.block_until_ready(yc)
    assert jnp.allclose(yc, c1 + c2), "mismatch vs reference (ragged size)"

    print("KERNEL_OK")
</pallas_src>

<mosaic_0001>
module attributes {stable_mosaic.version = 11 : i64} {
  func.func @_add_kernel(%arg0: i32, %arg1: memref<1x2048xf32, #tpu.memory_space<vmem>>, %arg2: memref<1x2048xf32, #tpu.memory_space<vmem>>, %arg3: memref<1x2048xf32, #tpu.memory_space<vmem>>) attributes {dimension_semantics = [#tpu.dimension_semantics<parallel>], iteration_bounds = array<i64: 1>, scalar_prefetch = 0 : i64, scratch_operands = 0 : i64, tpu.core_type = #tpu.core_type<tc>, window_params = [{transform_indices = @transform_0, window_bounds = array<i64: 1, 2048>}, {transform_indices = @transform_1, window_bounds = array<i64: 1, 2048>}, {transform_indices = @transform_2, window_bounds = array<i64: 1, 2048>}]} {
    %c0 = arith.constant 0 : index
    %c0_0 = arith.constant 0 : index
    %0 = vector.load %arg1[%c0, %c0_0] : memref<1x2048xf32, #tpu.memory_space<vmem>>, vector<1x2048xf32>
    %c0_1 = arith.constant 0 : index
    %c0_2 = arith.constant 0 : index
    %1 = vector.load %arg2[%c0_1, %c0_2] : memref<1x2048xf32, #tpu.memory_space<vmem>>, vector<1x2048xf32>
    %2 = arith.addf %0, %1 : vector<1x2048xf32>
    %c0_3 = arith.constant 0 : index
    %c0_4 = arith.constant 0 : index
    %3 = vector.load %arg3[%c0_3, %c0_4] : memref<1x2048xf32, #tpu.memory_space<vmem>>, vector<1x2048xf32>
    tpu.vector_store %arg3[%c0_3, %c0_4], %2 {strides = array<i32>} : memref<1x2048xf32, #tpu.memory_space<vmem>>, vector<1x2048xf32>,
    return
  }
  func.func @transform_0(%arg0: i32) -> (i32, i32) {
    %c0_i32 = arith.constant 0 : i32
    %c0_i32_0 = arith.constant 0 : i32
    return %arg0, %c0_i32 : i32, i32
  }
  func.func @transform_1(%arg0: i32) -> (i32, i32) {
    %c0_i32 = arith.constant 0 : i32
    %c0_i32_0 = arith.constant 0 : i32
    return %arg0, %c0_i32 : i32, i32
  }
  func.func @transform_2(%arg0: i32) -> (i32, i32) {
    %c0_i32 = arith.constant 0 : i32
    %c0_i32_0 = arith.constant 0 : i32
    return %arg0, %c0_i32 : i32, i32
  }
}

</mosaic_0001>

<bundles_post_ra>
// kernel: tpu_custom_call.1
= control target key start
LH: loop header
LB: loop body
LE: loop exit
PB: predicated region body
PF: predicated region fallthrough
CT: control target
= control target key end

     0   :  { %7 = vsyncpa [#allocation3], 0  ;;  %s189_s0 = inlined_call_operand.hbm [shape: f32[1,2048], index: 0, kind: input, shape index: {}]   ;;  %s190_s1 = inlined_call_operand.hbm [shape: f32[1,2048], index: 1, kind: input, shape index: {}]   ;;  %s191_s2 = inlined_call_operand.hbm [shape: f32[1,2048], index: 2, kind: output, shape index: {}]  }
   0x1   :  { %8 = vsyncpa [#allocation6], 0 }
   0x2   :  { %9 = vsyncpa [#allocation4], 0  ;;  %s135_s9 = smov [#allocation2]   ;;  %s136_s11 = smov [#allocation5]  }
   0x3   :  { %s16_s10 = sshll.u32 %s135_s9, 4  ;;  %s26_s12 = sshll.u32 %s136_s11, 4  ;;  %s17_s10 = int_to_ptr.vmem [resolvable:$true] %s16_s10  ;;  %s27_s12 = int_to_ptr.vmem [resolvable:$true] %s26_s12 }
   0x4   :  { %s63_s15 = scalar_lea.hbm %s189_s0, 256 }
   0x5   :  { %p64_p0 = scmp.ne.s32.totalorder %s189_s0, %s63_s15  ;;  %p67_p1 = scmp.lt.u32.totalorder %s63_s15, %s189_s0 }
   0x7   :  { %p69_p2 = pnand %p67_p1, %p64_p0 }
   0x9   :  { %72 = shalt.err (!%p69_p2)
}
   0xa   :  { %s73_s20 = scalar_lea.vmem %s17_s10, 256  ;;  %p78_p4 = scmp.lt.s32.totalorder %s17_s10, %s17_s10 }
   0xb   :  { %p74_p3 = scmp.ne.s32.totalorder %s17_s10, %s73_s20  ;;  %p79_p5 = scmp.lt.s32.totalorder %s73_s20, %s73_s20 }
   0xd   :  { %p80_p6 = por %p79_p5, %p78_p4 }
   0xf   :  { %p81_p7 = pnand %p80_p6, %p74_p3 }
  0x11   :  { %84 = shalt.err (!%p81_p7)
}
  0x12   :  { %19 = dma.hbm_to_vmem [thread:$0]  %s189_s0, 256, %s17_s10, [#allocation3]  }
  0x13   :  { %s85_s25 = scalar_lea.hbm %s190_s1, 256 }
  0x14   :  { %p86_p8 = scmp.ne.s32.totalorder %s190_s1, %s85_s25  ;;  %p89_p9 = scmp.lt.u32.totalorder %s85_s25, %s190_s1 }
  0x16   :  { %p91_p10 = pnand %p89_p9, %p86_p8 }
  0x18   :  { %94 = shalt.err (!%p91_p10)
}
  0x19   :  { %s95_s30 = scalar_lea.vmem %s27_s12, 256  ;;  %p100_p12 = scmp.lt.s32.totalorder %s27_s12, %s27_s12 }
  0x1a   :  { %p96_p11 = scmp.ne.s32.totalorder %s27_s12, %s95_s30  ;;  %p101_p13 = scmp.lt.s32.totalorder %s95_s30, %s95_s30 }
  0x1c   :  { %p102_p0 = por %p101_p13, %p100_p12 }
  0x1e   :  { %p103_p1 = pnand %p102_p0, %p96_p11 }
  0x20   :  { %106 = shalt.err (!%p103_p1)
}
  0x21   :  { %29 = dma.hbm_to_vmem [thread:$0]  %s190_s1, 256, %s27_s12, [#allocation6]  }
  0x22   :  { %129 = dma.done.wait [#allocation3], 256  }
  0x23   :  { %130 = vsyncadd [#allocation3], 4294967040 }
  0x24   :  { %131 = dma.done.wait [#allocation6], 256  }
  0x25   :  { %132 = vsyncadd [#allocation6], 4294967040  ;;  %s137_s4 = smov [#allocation7]   ;;  %v36_v0 = vld [vmem:[#allocation2] sm:$0xff]  ;;  %v38_v1 = vld [vmem:[#allocation5] sm:$0xff] }
  0x26   :  { %s50_s5 = sshll.u32 %s137_s4, 4  ;;  %v37_v2 = vld [vmem:[#allocation2 + $0x8] sm:$0xff]  ;;  %v40_v3 = vadd.f32 %v38_v1, %v36_v0  ;;  %v39_v4 = vld [vmem:[#allocation5 + $0x8] sm:$0xff]  ;;  %s51_s5 = int_to_ptr.vmem [resolvable:$true] %s50_s5 }
  0x27   :  { %v41_v5 = vadd.f32 %v39_v4, %v37_v2  ;;  %s107_s6 = scalar_lea.vmem %s51_s5, 256  ;;  %p112_p3 = scmp.lt.s32.totalorder %s51_s5, %s51_s5 }
  0x28   :  { %42 = vst [vmem:[#allocation7] sm:$0xff] %v40_v3  ;;  %p108_p2 = scmp.ne.s32.totalorder %s51_s5, %s107_s6  ;;  %p113_p4 = scmp.lt.s32.totalorder %s107_s6, %s107_s6 }
  0x29   :  { %43 = vst [vmem:[#allocation7 + $0x8] sm:$0xff] %v41_v5 }
  0x2a   :  { %p114_p5 = por %p113_p4, %p112_p3 }
  0x2c   :  { %p115_p6 = pnand %p114_p5, %p108_p2 }
  0x2e   :  { %118 = shalt.err (!%p115_p6)
}
  0x2f   :  { %s119_s8 = scalar_lea.hbm %s191_s2, 256 }
  0x30   :  { %p120_p7 = scmp.ne.s32.totalorder %s191_s2, %s119_s8  ;;  %p123_p8 = scmp.lt.u32.totalorder %s119_s8, %s191_s2 }
  0x32   :  { %p125_p9 = pnand %p123_p8, %p120_p7 }
  0x34   :  { %128 = shalt.err (!%p125_p9)
}
  0x35   :  { %53 = dma.vmem_to_hbm [thread:$0]  %s51_s5, 256, %s191_s2, [#allocation4]  }
  0x36   :  { %133 = dma.done.wait [#allocation4], 256  }
  0x37   :  { %134 = vsyncadd [#allocation4], 4294967040 }
  0x38   :  { %57 = vsyncpa [#allocation3], 1 }
  0x39   :  { %58 = vsyncpa [#allocation6], 1 }
  0x3a   :  { %59 = vsyncpa [#allocation4], 1 }

</bundles_post_ra>
